<compile_context>
chip_gen: v6e
topology: v6e:2x2x1
jax: 0.10.0
libtpu: 0.0.40
codegen_flags: <defaults>
</compile_context>

<pallas_src>
import jax
import jax.numpy as jnp
from jax import lax
from jax.experimental import pallas as pl
from jax.experimental.pallas import tpu as pltpu

IN_FEATURES = 42      # 1 * 6 * 7
F1 = 360              # 30 ch * 3 * 4 (conv1 output, flattened channel-major)
F2 = 240              # 120 ch * 1 * 2 (conv2 output, flattened channel-major)
F3 = 8                # linear1 output
OUT_FEATURES = 1      # linear2 output

_ALIGN = 16           # batch-tile alignment (covers bf16 sublane packing)


# ----------------------------------------------------------------------------
# Pallas kernel: whole fused forward for one batch tile.
# ----------------------------------------------------------------------------
def _cnn8_fused_kernel(x_ref, m1_ref, b1_ref, m2_ref, b2_ref,
                       m3_ref, b3_ref, m4_ref, b4_ref, alpha_ref, o_ref):
    # x_ref: (TB, 42) bf16; M* bf16; biases f32; alphas in SMEM.
    a1 = alpha_ref[0]
    a2 = alpha_ref[1]
    a3 = alpha_ref[2]

    # conv1 (folded) -> bias -> PReLU 1   (bf16 MXU, f32 accumulate/VPU)
    h = jnp.dot(x_ref[...], m1_ref[...], preferred_element_type=jnp.float32)
    h = h + b1_ref[...]
    h = jnp.where(h > 0, h, a1 * h)

    # avgpool1 ∘ conv2 (folded) -> bias -> PReLU 2
    h = jnp.dot(h.astype(jnp.bfloat16), m2_ref[...],
                preferred_element_type=jnp.float32)
    h = h + b2_ref[...]
    h = jnp.where(h > 0, h, a2 * h)

    # Dropout(p=0.4): identity in eval mode.
    # avgpool2 ∘ flatten ∘ linear1 (folded) -> bias -> PReLU 3
    h = jnp.dot(h.astype(jnp.bfloat16), m3_ref[...],
                preferred_element_type=jnp.float32)
    h = h + b3_ref[...]
    h = jnp.where(h > 0, h, a3 * h)

    # linear2
    y = jnp.dot(h.astype(jnp.bfloat16), m4_ref[...],
                preferred_element_type=jnp.float32)
    o_ref[...] = (y + b4_ref[...]).astype(o_ref.dtype)


# ----------------------------------------------------------------------------
# Wrapper-side helpers (tiny, O(params) work; not per-row).
# ----------------------------------------------------------------------------
def _avg_pool_nchw(x, kernel, stride):
    kh, kw = kernel
    sh, sw = stride
    n, c, h, w = x.shape
    oh = (h - kh) // sh + 1
    ow = (w - kw) // sw + 1
    acc = None
    for dy in range(kh):
        for dx in range(kw):
            part = x[:, :, dy:dy + (oh - 1) * sh + 1:sh,
                        dx:dx + (ow - 1) * sw + 1:sw]
            acc = part if acc is None else acc + part
    return acc / float(kh * kw)


def _build_fused_params(p):
    f32 = jnp.float32
    bf16 = jnp.bfloat16
    hi = lax.Precision.HIGHEST
    w1, b1 = p["w1"].astype(f32), p["b1"].astype(f32)
    w2, b2 = p["w2"].astype(f32), p["b2"].astype(f32)
    wl1, bl1 = p["wl1"].astype(f32), p["bl1"].astype(f32)
    wl2, bl2 = p["wl2"].astype(f32), p["bl2"].astype(f32)

    dn = ("NCHW", "OIHW", "NCHW")

    # M1: conv1 as a dense (42 -> 360) map (stride 2, padding (0,1) baked in).
    eye_in = jnp.eye(IN_FEATURES, dtype=f32).reshape(IN_FEATURES, 1, 6, 7)
    c1 = lax.conv_general_dilated(
        eye_in, w1, window_strides=(2, 2), padding=[(0, 0), (1, 1)],
        dimension_numbers=dn, precision=hi)
    assert c1.shape == (IN_FEATURES, 30, 3, 4), c1.shape
    m1 = c1.reshape(IN_FEATURES, F1)
    b1v = jnp.repeat(b1, 12).reshape(1, F1)          # per channel, 12 positions

    # M2: (conv2 ∘ avgpool1) as a dense (360 -> 240) map.
    eye_h1 = jnp.eye(F1, dtype=f32).reshape(F1, 30, 3, 4)
    pooled = _avg_pool_nchw(eye_h1, (2, 2), (1, 1))  # (360, 30, 2, 3)
    c2 = lax.conv_general_dilated(
        pooled, w2, window_strides=(1, 1), padding="VALID",
        dimension_numbers=dn, precision=hi)
    assert c2.shape == (F1, 120, 1, 2), c2.shape
    m2 = c2.reshape(F1, F2)
    b2v = jnp.repeat(b2, 2).reshape(1, F2)           # per channel, 2 positions

    # M3: (linear1 ∘ flatten ∘ avgpool2((1,2))) as a dense (240 -> 8) map.
    assert wl1.shape == (F3, 120), wl1.shape
    m3 = 0.5 * jnp.repeat(wl1.T, 2, axis=0)          # (240, 8)
    assert m3.shape == (F2, F3), m3.shape
    b3v = bl1.reshape(1, F3)

    # M4: linear2.
    m4 = wl2.T                                       # (8, 1)
    b4v = bl2.reshape(1, OUT_FEATURES)

    alphas = jnp.stack([jnp.asarray(p["a1"], f32).reshape(()),
                        jnp.asarray(p["a2"], f32).reshape(()),
                        jnp.asarray(p["a3"], f32).reshape(())])   # (3,) f32

    return (m1.astype(bf16), b1v, m2.astype(bf16), b2v,
            m3.astype(bf16), b3v, m4.astype(bf16), b4v, alphas)


def _round_up(n, m):
    return ((n + m - 1) // m) * m


def _choose_tile(b, tb_max):
    """Pick (tile, n_tiles): tile multiple of _ALIGN, n_tiles even when >1."""
    if b <= _ALIGN:
        return _ALIGN, 1
    # Even number of tiles (balances the two v7x TensorCores), tiles <= tb_max.
    n_tiles = max(2, 2 * ((b + 2 * tb_max - 1) // (2 * tb_max)))
    tb = _round_up((b + n_tiles - 1) // n_tiles, _ALIGN)
    return tb, n_tiles


def cnn8_forward(x, params, *, tb_max=4096):
    """x: (B, 1, 6, 7) float. Returns (B, 1) logits (eval-mode forward)."""
    B = x.shape[0]
    assert x.shape[1:] == (1, 6, 7), x.shape
    # bf16 input stream: halves HBM traffic for the dominant operand.
    x_flat = x.reshape(B, IN_FEATURES).astype(jnp.bfloat16)

    (m1, b1v, m2, b2v, m3, b3v, m4, b4v, alphas) = _build_fused_params(params)

    tb, n_tiles = _choose_tile(B, tb_max)
    b_pad = n_tiles * tb
    if b_pad != B:
        x_flat = jnp.pad(x_flat, ((0, b_pad - B), (0, 0)))

    flops = 2 * b_pad * (IN_FEATURES * F1 + F1 * F2 + F2 * F3 + F3 * OUT_FEATURES)
    bytes_accessed = (
        b_pad * (IN_FEATURES * 2 + OUT_FEATURES * 4)            # x bf16 in, y f32 out
        + 2 * (IN_FEATURES * F1 + F1 * F2 + F2 * F3 + F3 * OUT_FEATURES)  # bf16 W
        + 4 * (F1 + F2 + F3 + OUT_FEATURES + 3))                # f32 biases + alphas
    cost = pl.CostEstimate(flops=flops, transcendentals=0,
                           bytes_accessed=bytes_accessed)

    # VMEM budget: resident weights + ~7 KB/row of tile working set, capped so
    # it never exceeds v7x's 64 MiB per-TC VMEM.
    vmem_limit = max(32 * 1024 * 1024,
                     min(64 * 1024 * 1024, 8 * 1024 * 1024 + tb * 7 * 1024))

    const = lambda i: (0, 0)   # weights: same block every grid step (resident)
    out = pl.pallas_call(
        _cnn8_fused_kernel,
        out_shape=jax.ShapeDtypeStruct((b_pad, OUT_FEATURES), jnp.float32),
        grid_spec=pltpu.PrefetchScalarGridSpec(
            num_scalar_prefetch=0,
            grid=(n_tiles,),
            in_specs=[
                pl.BlockSpec((tb, IN_FEATURES), lambda i: (i, 0)),  # x tile
                pl.BlockSpec((IN_FEATURES, F1), const),             # M1 (bf16)
                pl.BlockSpec((1, F1), const),                       # b1 (f32)
                pl.BlockSpec((F1, F2), const),                      # M2 (bf16)
                pl.BlockSpec((1, F2), const),                       # b2 (f32)
                pl.BlockSpec((F2, F3), const),                      # M3 (bf16)
                pl.BlockSpec((1, F3), const),                       # b3 (f32)
                pl.BlockSpec((F3, OUT_FEATURES), const),            # M4 (bf16)
                pl.BlockSpec((1, OUT_FEATURES), const),             # b4 (f32)
                pl.BlockSpec(memory_space=pltpu.MemorySpace.SMEM),  # alphas (3,)
            ],
            out_specs=pl.BlockSpec((tb, OUT_FEATURES), lambda i: (i, 0)),
        ),
        compiler_params=pltpu.CompilerParams(
            dimension_semantics=("parallel",),   # shard batch across v7x TCs
            vmem_limit_bytes=vmem_limit),
        cost_estimate=cost,
    )(x_flat, m1, b1v, m2, b2v, m3, b3v, m4, b4v, alphas)
    return out[:B]


# ----------------------------------------------------------------------------
# Pure-JAX reference (eval-mode) and deterministic PyTorch-like init.
# ----------------------------------------------------------------------------
def cnn8_ref(x, p):
    dn = ("NCHW", "OIHW", "NCHW")
    out = lax.conv_general_dilated(x, p["w1"], (2, 2), [(0, 0), (1, 1)],
                                   dimension_numbers=dn)
    out = out + p["b1"][None, :, None, None]
    out = jnp.where(out > 0, out, p["a1"] * out)
    out = _avg_pool_nchw(out, (2, 2), (1, 1))
    out = lax.conv_general_dilated(out, p["w2"], (1, 1), "VALID",
                                   dimension_numbers=dn)
    out = out + p["b2"][None, :, None, None]
    out = jnp.where(out > 0, out, p["a2"] * out)
    out = _avg_pool_nchw(out, (1, 2), (1, 2))
    out = out.reshape(out.shape[0], -1)          # (B, 120); dropout = identity
    out = out @ p["wl1"].T + p["bl1"]
    out = jnp.where(out > 0, out, p["a3"] * out)
    out = out @ p["wl2"].T + p["bl2"]
    return out


def init_params(key):
    ks = jax.random.split(key, 8)

    def u(k, shape, fan_in):
        bound = float(fan_in) ** -0.5
        return jax.random.uniform(k, shape, jnp.float32, -bound, bound)

    return {
        "w1": u(ks[0], (30, 1, 2, 2), 1 * 2 * 2),
        "b1": u(ks[1], (30,), 1 * 2 * 2),
        "w2": u(ks[2], (120, 30, 2, 2), 30 * 2 * 2),
        "b2": u(ks[3], (120,), 30 * 2 * 2),
        "wl1": u(ks[4], (8, 120), 120),
        "bl1": u(ks[5], (8,), 120),
        "wl2": u(ks[6], (1, 8), 8),
        "bl2": u(ks[7], (1,), 8),
        "a1": jnp.float32(0.25),   # nn.PReLU() default init
        "a2": jnp.float32(0.25),
        "a3": jnp.float32(0.25),
    }


if __name__ == "__main__":
    key = jax.random.PRNGKey(0)
    k_params, k_small, k_big = jax.random.split(key, 3)
    params = init_params(k_params)

    fwd = jax.jit(cnn8_forward)

    # Small-shape check (B=2), shape implied by the module: (B, 1, 6, 7).
    x_small = jax.random.normal(k_small, (2, 1, 6, 7), jnp.float32)
    y_small = jax.block_until_ready(fwd(x_small, params))
    ref_small = cnn8_ref(x_small, params)
    assert y_small.shape == (2, 1), y_small.shape
    # bf16 operands (f32 accumulation) -> not bit-exact vs the f32 reference.
    assert jnp.allclose(y_small, ref_small, atol=2e-2, rtol=2e-2), "small mismatch"

    # Multi-tile check: exercises the batch grid, tail padding and output slice.
    x_big = jax.random.normal(k_big, (2500, 1, 6, 7), jnp.float32)
    y_big = jax.block_until_ready(fwd(x_big, params))
    ref_big = cnn8_ref(x_big, params)
    assert y_big.shape == (2500, 1), y_big.shape
    assert jnp.allclose(y_big, ref_big, atol=2e-2, rtol=2e-2), "big mismatch"

    print("KERNEL_OK")
</pallas_src>

<mosaic_0001>
module attributes {stable_mosaic.version = 11 : i64} {
  func.func @_cnn8_fused_kernel(%arg0: i32, %arg1: memref<16x42xbf16, #tpu.memory_space<vmem>>, %arg2: memref<42x360xbf16, #tpu.memory_space<vmem>>, %arg3: memref<1x360xf32, #tpu.memory_space<vmem>>, %arg4: memref<360x240xbf16, #tpu.memory_space<vmem>>, %arg5: memref<1x240xf32, #tpu.memory_space<vmem>>, %arg6: memref<240x8xbf16, #tpu.memory_space<vmem>>, %arg7: memref<1x8xf32, #tpu.memory_space<vmem>>, %arg8: memref<8x1xbf16, #tpu.memory_space<vmem>>, %arg9: memref<1x1xf32, #tpu.memory_space<vmem>>, %arg10: memref<3xf32, #tpu.memory_space<smem>>, %arg11: memref<16x1xf32, #tpu.memory_space<vmem>>) attributes {dimension_semantics = [#tpu.dimension_semantics<parallel>], iteration_bounds = array<i64: 1>, scalar_prefetch = 0 : i64, scratch_operands = 0 : i64, tpu.core_type = #tpu.core_type<tc>, window_params = [{transform_indices = @transform_0, window_bounds = array<i64: 16, 42>}, {pipeline_mode = #tpu.pipeline_mode<synchronous>, transform_indices = @transform_1, window_bounds = array<i64: 42, 360>}, {pipeline_mode = #tpu.pipeline_mode<synchronous>, transform_indices = @transform_2, window_bounds = array<i64: 1, 360>}, {pipeline_mode = #tpu.pipeline_mode<synchronous>, transform_indices = @transform_3, window_bounds = array<i64: 360, 240>}, {pipeline_mode = #tpu.pipeline_mode<synchronous>, transform_indices = @transform_4, window_bounds = array<i64: 1, 240>}, {pipeline_mode = #tpu.pipeline_mode<synchronous>, transform_indices = @transform_5, window_bounds = array<i64: 240, 8>}, {pipeline_mode = #tpu.pipeline_mode<synchronous>, transform_indices = @transform_6, window_bounds = array<i64: 1, 8>}, {pipeline_mode = #tpu.pipeline_mode<synchronous>, transform_indices = @transform_7, window_bounds = array<i64: 8, 1>}, {pipeline_mode = #tpu.pipeline_mode<synchronous>, transform_indices = @transform_8, window_bounds = array<i64: 1, 1>}, {transform_indices = @transform_9, window_bounds = array<i64: 3>}, {transform_indices = @transform_10, window_bounds = array<i64: 16, 1>}]} {
    %c0 = arith.constant 0 : index
    %0 = memref.load %arg10[%c0] : memref<3xf32, #tpu.memory_space<smem>>
    %c1 = arith.constant 1 : index
    %1 = memref.load %arg10[%c1] : memref<3xf32, #tpu.memory_space<smem>>
    %c2 = arith.constant 2 : index
    %2 = memref.load %arg10[%c2] : memref<3xf32, #tpu.memory_space<smem>>
    %c0_0 = arith.constant 0 : index
    %c0_1 = arith.constant 0 : index
    %3 = vector.load %arg1[%c0_0, %c0_1] : memref<16x42xbf16, #tpu.memory_space<vmem>>, vector<16x42xbf16>
    %c0_2 = arith.constant 0 : index
    %c0_3 = arith.constant 0 : index
    %4 = vector.load %arg2[%c0_2, %c0_3] : memref<42x360xbf16, #tpu.memory_space<vmem>>, vector<42x360xbf16>
    %cst = arith.constant dense<0.000000e+00> : vector<16x360xf32>
    %5 = tpu.matmul %3, %4, %cst {dimension_numbers = #tpu.dot_dimension_numbers<[1], [0], [0], [1], [0, 0, 1, 1], [], []>} : vector<16x42xbf16>, vector<42x360xbf16>, vector<16x360xf32> -> vector<16x360xf32>
    %c0_4 = arith.constant 0 : index
    %c0_5 = arith.constant 0 : index
    %6 = vector.load %arg3[%c0_4, %c0_5] : memref<1x360xf32, #tpu.memory_space<vmem>>, vector<1x360xf32>
    %7 = vector.broadcast %6 : vector<1x360xf32> to vector<16x360xf32>
    %8 = arith.addf %5, %7 : vector<16x360xf32>
    %cst_6 = arith.constant 0.000000e+00 : f32
    %9 = vector.broadcast %cst_6 : f32 to vector<16x360xf32>
    %10 = arith.cmpf ogt, %8, %9 : vector<16x360xf32>
    %11 = vector.broadcast %0 : f32 to vector<16x360xf32>
    %12 = arith.mulf %11, %8 : vector<16x360xf32>
    %13 = arith.select %10, %8, %12 : vector<16x360xi1>, vector<16x360xf32>
    %14 = arith.truncf %13 : vector<16x360xf32> to vector<16x360xbf16>
    %c0_7 = arith.constant 0 : index
    %c0_8 = arith.constant 0 : index
    %15 = vector.load %arg4[%c0_7, %c0_8] : memref<360x240xbf16, #tpu.memory_space<vmem>>, vector<360x240xbf16>
    %cst_9 = arith.constant dense<0.000000e+00> : vector<16x240xf32>
    %16 = tpu.matmul %14, %15, %cst_9 {dimension_numbers = #tpu.dot_dimension_numbers<[1], [0], [0], [1], [0, 0, 1, 1], [], []>} : vector<16x360xbf16>, vector<360x240xbf16>, vector<16x240xf32> -> vector<16x240xf32>
    %c0_10 = arith.constant 0 : index
    %c0_11 = arith.constant 0 : index
    %17 = vector.load %arg5[%c0_10, %c0_11] : memref<1x240xf32, #tpu.memory_space<vmem>>, vector<1x240xf32>
    %18 = vector.broadcast %17 : vector<1x240xf32> to vector<16x240xf32>
    %19 = arith.addf %16, %18 : vector<16x240xf32>
    %cst_12 = arith.constant 0.000000e+00 : f32
    %20 = vector.broadcast %cst_12 : f32 to vector<16x240xf32>
    %21 = arith.cmpf ogt, %19, %20 : vector<16x240xf32>
    %22 = vector.broadcast %1 : f32 to vector<16x240xf32>
    %23 = arith.mulf %22, %19 : vector<16x240xf32>
    %24 = arith.select %21, %19, %23 : vector<16x240xi1>, vector<16x240xf32>
    %25 = arith.truncf %24 : vector<16x240xf32> to vector<16x240xbf16>
    %c0_13 = arith.constant 0 : index
    %c0_14 = arith.constant 0 : index
    %26 = vector.load %arg6[%c0_13, %c0_14] : memref<240x8xbf16, #tpu.memory_space<vmem>>, vector<240x8xbf16>
    %cst_15 = arith.constant dense<0.000000e+00> : vector<16x8xf32>
    %27 = tpu.matmul %25, %26, %cst_15 {dimension_numbers = #tpu.dot_dimension_numbers<[1], [0], [0], [1], [0, 0, 1, 1], [], []>} : vector<16x240xbf16>, vector<240x8xbf16>, vector<16x8xf32> -> vector<16x8xf32>
    %c0_16 = arith.constant 0 : index
    %c0_17 = arith.constant 0 : index
    %28 = vector.load %arg7[%c0_16, %c0_17] : memref<1x8xf32, #tpu.memory_space<vmem>>, vector<1x8xf32>
    %29 = vector.broadcast %28 : vector<1x8xf32> to vector<16x8xf32>
    %30 = arith.addf %27, %29 : vector<16x8xf32>
    %cst_18 = arith.constant 0.000000e+00 : f32
    %31 = vector.broadcast %cst_18 : f32 to vector<16x8xf32>
    %32 = arith.cmpf ogt, %30, %31 : vector<16x8xf32>
    %33 = vector.broadcast %2 : f32 to vector<16x8xf32>
    %34 = arith.mulf %33, %30 : vector<16x8xf32>
    %35 = arith.select %32, %30, %34 : vector<16x8xi1>, vector<16x8xf32>
    %36 = arith.truncf %35 : vector<16x8xf32> to vector<16x8xbf16>
    %c0_19 = arith.constant 0 : index
    %c0_20 = arith.constant 0 : index
    %37 = vector.load %arg8[%c0_19, %c0_20] : memref<8x1xbf16, #tpu.memory_space<vmem>>, vector<8x1xbf16>
    %cst_21 = arith.constant dense<0.000000e+00> : vector<16x1xf32>
    %38 = tpu.matmul %36, %37, %cst_21 {dimension_numbers = #tpu.dot_dimension_numbers<[1], [0], [0], [1], [0, 0, 1, 1], [], []>} : vector<16x8xbf16>, vector<8x1xbf16>, vector<16x1xf32> -> vector<16x1xf32>
    %c0_22 = arith.constant 0 : index
    %c0_23 = arith.constant 0 : index
    %39 = vector.load %arg9[%c0_22, %c0_23] : memref<1x1xf32, #tpu.memory_space<vmem>>, vector<1x1xf32>
    %40 = vector.broadcast %39 : vector<1x1xf32> to vector<16x1xf32>
    %41 = arith.addf %38, %40 : vector<16x1xf32>
    %c0_24 = arith.constant 0 : index
    %c0_25 = arith.constant 0 : index
    %42 = vector.load %arg11[%c0_24, %c0_25] : memref<16x1xf32, #tpu.memory_space<vmem>>, vector<16x1xf32>
    tpu.vector_store %arg11[%c0_24, %c0_25], %41 {strides = array<i32>} : memref<16x1xf32, #tpu.memory_space<vmem>>, vector<16x1xf32>,
    return
  }
  func.func @transform_0(%arg0: i32) -> (i32, i32) {
    %c0_i32 = arith.constant 0 : i32
    %c0_i32_0 = arith.constant 0 : i32
    return %arg0, %c0_i32 : i32, i32
  }
  func.func @transform_1(%arg0: i32) -> (i32, i32) {
    %c0_i32 = arith.constant 0 : i32
    %c0_i32_0 = arith.constant 0 : i32
    %c0_i32_1 = arith.constant 0 : i32
    return %c0_i32, %c0_i32_0 : i32, i32
  }
  func.func @transform_2(%arg0: i32) -> (i32, i32) {
    %c0_i32 = arith.constant 0 : i32
    %c0_i32_0 = arith.constant 0 : i32
    %c0_i32_1 = arith.constant 0 : i32
    return %c0_i32, %c0_i32_0 : i32, i32
  }
  func.func @transform_3(%arg0: i32) -> (i32, i32) {
    %c0_i32 = arith.constant 0 : i32
    %c0_i32_0 = arith.constant 0 : i32
    %c0_i32_1 = arith.constant 0 : i32
    return %c0_i32, %c0_i32_0 : i32, i32
  }
  func.func @transform_4(%arg0: i32) -> (i32, i32) {
    %c0_i32 = arith.constant 0 : i32
    %c0_i32_0 = arith.constant 0 : i32
    %c0_i32_1 = arith.constant 0 : i32
    return %c0_i32, %c0_i32_0 : i32, i32
  }
  func.func @transform_5(%arg0: i32) -> (i32, i32) {
    %c0_i32 = arith.constant 0 : i32
    %c0_i32_0 = arith.constant 0 : i32
    %c0_i32_1 = arith.constant 0 : i32
    return %c0_i32, %c0_i32_0 : i32, i32
  }
  func.func @transform_6(%arg0: i32) -> (i32, i32) {
    %c0_i32 = arith.constant 0 : i32
    %c0_i32_0 = arith.constant 0 : i32
    %c0_i32_1 = arith.constant 0 : i32
    return %c0_i32, %c0_i32_0 : i32, i32
  }
  func.func @transform_7(%arg0: i32) -> (i32, i32) {
    %c0_i32 = arith.constant 0 : i32
    %c0_i32_0 = arith.constant 0 : i32
    %c0_i32_1 = arith.constant 0 : i32
    return %c0_i32, %c0_i32_0 : i32, i32
  }
  func.func @transform_8(%arg0: i32) -> (i32, i32) {
    %c0_i32 = arith.constant 0 : i32
    %c0_i32_0 = arith.constant 0 : i32
    %c0_i32_1 = arith.constant 0 : i32
    return %c0_i32, %c0_i32_0 : i32, i32
  }
  func.func @transform_9(%arg0: i32) -> i32 {
    %c0_i32 = arith.constant 0 : i32
    %c0_i32_0 = arith.constant 0 : i32
    return %c0_i32 : i32
  }
  func.func @transform_10(%arg0: i32) -> (i32, i32) {
    %c0_i32 = arith.constant 0 : i32
    %c0_i32_0 = arith.constant 0 : i32
    return %arg0, %c0_i32 : i32, i32
  }
}

</mosaic_0001>

<bundles_post_ra>
// kernel: cnn8_forward.1
= control target key start
LH: loop header
LB: loop body
LE: loop exit
PB: predicated region body
PF: predicated region fallthrough
CT: control target
= control target key end

     0   :  { %s1450_s0 = inlined_call_operand.vmem [shape: bf16[16,42], index: 0, kind: input, shape index: {}]   ;;  %s1451_s1 = inlined_call_operand.vmem [shape: bf16[42,360], index: 1, kind: input, shape index: {}]   ;;  %s1452_s2 = inlined_call_operand.vmem [shape: f32[1,360], index: 2, kind: input, shape index: {}]   ;;  %s1453_s3 = inlined_call_operand.vmem [shape: bf16[360,240], index: 3, kind: input, shape index: {}]   ;;  %s1454_s4 = inlined_call_operand.vmem [shape: f32[1,240], index: 4, kind: input, shape index: {}]   ;;  %s1455_s5 = inlined_call_operand.vmem [shape: bf16[240,8], index: 5, kind: input, shape index: {}]   ;;  %s1456_s6 = inlined_call_operand.vmem [shape: f32[1,8], index: 6, kind: input, shape index: {}]   ;;  %s1457_s7 = inlined_call_operand.vmem [shape: bf16[8,1], index: 7, kind: input, shape index: {}]   ;;  %s1458_s8 = inlined_call_operand.<no memory space> [shape: f32[1,1], index: 8, kind: input, shape index: {}]   ;;  %s1459_s9 = inlined_call_operand.vmem [shape: f32[3], index: 9, kind: input, shape index: {}]   ;;  %s1460_s10 = inlined_call_operand.vmem [shape: f32[16,1], index: 10, kind: output, shape index: {}]  }
   0x1   :  { %v15_v0 = vstv %s1458_s8 }
   0x2   :  { %16 = vst [vmem:[#allocation2] sm:$0x1] %v15_v0 }
   0x3   :  { %17 = vsyncpa [#allocation4], 0  ;;  %s42_s17 = sshll.u32 %s1459_s9, 4  ;;  %s43_s17 = int_to_ptr.vmem [resolvable:$true] %s42_s17 }
   0x4   :  { %s1097_s18 = scalar_lea.vmem %s43_s17, 16  ;;  %p1102_p1 = scmp.lt.s32.totalorder %s43_s17, %s43_s17 }
   0x5   :  { %p1098_p0 = scmp.ne.s32.totalorder %s43_s17, %s1097_s18  ;;  %p1103_p2 = scmp.lt.s32.totalorder %s1097_s18, %s1097_s18 }
   0x7   :  { %p1104_p3 = por %p1103_p2, %p1102_p1 }
   0x9   :  { %p1105_p4 = pnand %p1104_p3, %p1098_p0 }
   0xb   :  { %1108 = shalt.err (!%p1105_p4)
}
   0xc   :  { %s1111_s19 = smov [#allocation3]  }
   0xd   :  { %45 = dma.vmem_to_smem %s43_s17, 16, %s1111_s19, [#allocation4]  }
   0xe   :  { %1109 = dma.done.wait [#allocation4], 16  }
   0xf   :  { %1110 = vsyncadd [#allocation4], 4294967280 }
  0x10   :  { %49 = sfence }
  0x11   :  { %v1001_v1 = vld [vmem:[%s1451_s1 + $0x34] ss:$12 sps:$4 sm:$0x1f]   ;;  %vm139_vm0 = vcmask 1044480   ;;  %v1004_v3 = vld [vmem:[%s1451_s1 + $0x1c] ss:$12 sps:$4 sm:$0xff]   ;;  %v70_v63 = vlaneseq }
  0x12   :  { %v1003_v2 = vld [vmem:[%s1451_s1 + $0x30] ss:$12 sps:$4 sm:$0x1f]   ;;  %905 = vmatprep.subr.msk.bf16.mxu0 %vm139_vm0, %v1001_v1  ;;  %v1112_v5 = vmov 0   ;;  %v1006_v6 = vld [vmem:[%s1451_s1 + $0x18] ss:$12 sps:$4 sm:$0xff]  }
  0x13   :  { %v141_v4 = vsel %vm139_vm0, %v1003_v2, 0  ;;  %181 = vmatprep.mubr.bf16.mxu0 %v1112_v5  ;;  %623 = vmatprep.mubr.bf16.mxu1 %v1112_v5  ;;  %v1007_v7 = vld [vmem:[%s1451_s1 + $0x4] ss:$12 sps:$4 sm:$0xff]   ;;  %v1009_v8 = vld [vmem:[%s1451_s1] ss:$12 sps:$4 sm:$0xff]   ;;  %vm135_vm1 = vcmask 343040  }
  0x14   :  { %160 = vmatpush1.bf16.msra.mxu0 %v141_v4  ;;  %v1011_v9 = vld [vmem:[%s1451_s1 + $0x38] ss:$12 sps:$4 sm:$0x1f]   ;;  %v1113_v11 = vmov 0.0   ;;  %v1012_v13 = vld [vmem:[%s1451_s1 + $0x20] ss:$12 sps:$4 sm:$0xff]  }
  0x15   :  { %161 = vmatprep.subr.bf16.mxu0 %v1004_v3  ;;  %v1010_v10 = vld [vmem:[%s1450_s0] sm:$0xff]   ;;  %v147_v12 = vsel %vm139_vm0, %v1011_v9, 0  ;;  %vm1114_vm2 = vmmov 0   ;;  %v1013_v14 = vld [vmem:[%s1451_s1 + $0x8] ss:$12 sps:$4 sm:$0xff]   ;;  %vm541_vm3 = vcmask 1043456  }
  0x16   :  { %v1016_v15 = vld [vmem:[%s1453_s3 + $0x74] ss:$8 sps:$4 sm:$0xff]   ;;  %v1014_v16 = vld [vmem:[%s1453_s3 + $0x70] ss:$8 sps:$4 sm:$0xff]   ;;  %v299_v17 = vld [vmem:[%s1453_s3 + $0x160] sm:$0xff]  ;;  %v1357_v0 = vshrl.u32 %v70_v63, 7 }
  0x17   :  { %v1019_v18 = vld [vmem:[%s1453_s3 + $0x64] ss:$8 sps:$4 sm:$0xff]   ;;  %v953_v19 = vcombine.high %v299_v17, %v299_v17  ;;  %v952_v20 = vcombine.low %v299_v17, %v299_v17  ;;  %v1017_v21 = vld [vmem:[%s1453_s3 + $0x60] ss:$8 sps:$4 sm:$0xff]   ;;  %v1022_v22 = vld [vmem:[%s1453_s3 + $0x54] ss:$8 sps:$4 sm:$0xff]  }
  0x18   :  { %162 = vmatpush1.bf16.msra.mxu0 %v1006_v6  ;;  %v1020_v24 = vld [vmem:[%s1453_s3 + $0x50] ss:$8 sps:$4 sm:$0xff]   ;;  %v1025_v25 = vld [vmem:[%s1453_s3 + $0x44] ss:$8 sps:$4 sm:$0xff]   ;;  %v1023_v26 = vld [vmem:[%s1453_s3 + $0x40] ss:$8 sps:$4 sm:$0xff]  }
  0x19   :  { %163 = vmatprep.subr.bf16.mxu0 %v1007_v7  ;;  %954 = vmatprep.subr.msk.bf16.mxu1 %vm541_vm3, %v953_v19  ;;  %v543_v23 = vsel %vm541_vm3, %v952_v20, 0  ;;  %v1028_v27 = vld [vmem:[%s1453_s3 + $0x34] ss:$8 sps:$4 sm:$0xff]   ;;  %v1026_v28 = vld [vmem:[%s1453_s3 + $0x30] ss:$8 sps:$4 sm:$0xff]   ;;  %v76_v1 = vsub.s32 1, %v1357_v0 }
  0x1a   :  { %594 = vmatpush1.bf16.msra.mxu1 %v543_v23  ;;  %v1031_v29 = vld [vmem:[%s1453_s3 + $0x24] ss:$8 sps:$4 sm:$0xff]   ;;  %v1029_v30 = vld [vmem:[%s1453_s3 + $0x20] ss:$8 sps:$4 sm:$0xff]   ;;  %v1034_v31 = vld [vmem:[%s1453_s3 + $0x14] ss:$8 sps:$4 sm:$0xff]  }
  0x1b   :  { %v1032_v32 = vld [vmem:[%s1453_s3 + $0x10] ss:$8 sps:$4 sm:$0xff]   ;;  %v1037_v33 = vld [vmem:[%s1453_s3 + $0x4] ss:$8 sps:$4 sm:$0xff]   ;;  %v1035_v34 = vld [vmem:[%s1453_s3] ss:$8 sps:$4 sm:$0xff]  }
  0x1c   :  { %164 = vmatpush1.bf16.msra.mxu0 %v1009_v8  ;;  %v1040_v35 = vld [vmem:[%s1453_s3 + $0xf4] ss:$8 sps:$4 sm:$0xff]   ;;  %v1038_v36 = vld [vmem:[%s1453_s3 + $0xf0] ss:$8 sps:$4 sm:$0xff]   ;;  %v1043_v37 = vld [vmem:[%s1453_s3 + $0xe4] ss:$8 sps:$4 sm:$0xff]  }
  0x1d   :  { %981 = vmatprep.subr.bf16.mxu0 %v1113_v11  ;;  %v1041_v38 = vld [vmem:[%s1453_s3 + $0xe0] ss:$8 sps:$4 sm:$0xff]   ;;  %v1046_v39 = vld [vmem:[%s1453_s3 + $0xd4] ss:$8 sps:$4 sm:$0xff]   ;;  %v1044_v40 = vld [vmem:[%s1453_s3 + $0xd0] ss:$8 sps:$4 sm:$0xff]  }
  0x1e   :  { %v1049_v41 = vld [vmem:[%s1453_s3 + $0xc4] ss:$8 sps:$4 sm:$0xff]   ;;  %v1047_v42 = vld [vmem:[%s1453_s3 + $0xc0] ss:$8 sps:$4 sm:$0xff]   ;;  %v1054_v43 = vld [vmem:[%s1453_s3 + $0xb4] ss:$8 sps:$4 sm:$0xff]  }
  0x1f   :  { %906 = vmatmul.mubr.msk.bf16.vlgmr.msra.gmra.mxu0 %vm135_vm1, %v1010_v10  ;;  %v1052_v44 = vld [vmem:[%s1453_s3 + $0xb0] ss:$8 sps:$4 sm:$0xff]   ;;  %v1055_v45 = vld [vmem:[%s1453_s3 + $0x154] ss:$8 sps:$4 sm:$0xff]   ;;  %v1060_v47 = vld [vmem:[%s1453_s3 + $0xa4] ss:$8 sps:$4 sm:$0xff]  }
  0x20   :  { %982 = vmatpush3.bf16.msra.mxu0 %v147_v12  ;;  %987 = vmatprep.mubr.msk.bf16.mxu0 %vm1114_vm2, %v1113_v11  ;;  %v1057_v46 = vld [vmem:[%s1453_s3 + $0x150] ss:$8 sps:$4 sm:$0xff]   ;;  %v1058_v48 = vld [vmem:[%s1453_s3 + $0xa0] ss:$8 sps:$4 sm:$0xff]   ;;  %v1061_v49 = vld [vmem:[%s1453_s3 + $0x144] ss:$8 sps:$4 sm:$0xff]  }
  0x21   :  { %983 = vmatprep.subr.bf16.mxu0 %v1113_v11  ;;  %595 = vmatprep.subr.bf16.mxu1 %v1055_v45  ;;  %v1063_v50 = vld [vmem:[%s1453_s3 + $0x140] ss:$8 sps:$4 sm:$0xff]   ;;  %v1066_v51 = vld [vmem:[%s1453_s3 + $0x94] ss:$8 sps:$4 sm:$0xff]   ;;  %v1064_v52 = vld [vmem:[%s1453_s3 + $0x90] ss:$8 sps:$4 sm:$0xff]  }
  0x22   :  { %596 = vmatpush1.bf16.msra.mxu1 %v1057_v46  ;;  %v1067_v53 = vld [vmem:[%s1453_s3 + $0x134] ss:$8 sps:$4 sm:$0xff]   ;;  %v1069_v54 = vld [vmem:[%s1453_s3 + $0x130] ss:$8 sps:$4 sm:$0xff]   ;;  %v1072_v55 = vld [vmem:[%s1453_s3 + $0x84] ss:$8 sps:$4 sm:$0xff]  }
  0x23   :  { %597 = vmatprep.subr.bf16.mxu1 %v1061_v49  ;;  %v1070_v56 = vld [vmem:[%s1453_s3 + $0x80] ss:$8 sps:$4 sm:$0xff]   ;;  %v1073_v57 = vld [vmem:[%s1453_s3 + $0x124] ss:$8 sps:$4 sm:$0xff]   ;;  %v1076_v59 = vld [vmem:[%s1453_s3 + $0x114] ss:$8 sps:$4 sm:$0xff]  }
  0x24   :  { %984 = vmatpush3.bf16.msra.mxu0 %v1012_v13  ;;  %v1075_v58 = vld [vmem:[%s1453_s3 + $0x120] ss:$8 sps:$4 sm:$0xff]   ;;  %v1078_v60 = vld [vmem:[%s1453_s3 + $0x110] ss:$8 sps:$4 sm:$0xff]   ;;  %v1079_v61 = vld [vmem:[%s1453_s3 + $0x104] ss:$8 sps:$4 sm:$0xff]  }
  0x25   :  { %985 = vmatprep.subr.bf16.mxu0 %v1113_v11  ;;  %v1081_v62 = vld [vmem:[%s1453_s3 + $0x100] ss:$8 sps:$4 sm:$0xff]   ;;  %v72_v2 = vsub.s32 0, %v1357_v0  ;;  %s51_s12 = sld [smem:[#allocation3]]  ;;  %vm537_vm10 = vcmask 850944   ;;  %vm776_vm15 = vcmask 916480  }
  0x26   :  { %598 = vmatpush1.bf16.msra.mxu1 %v1063_v50  ;;  %v68_v3 = vld [vmem:[%s1452_s2] sm:$0x7]  ;;  %v1088_v45 = vld [vmem:[%s1455_s5 + $0x8] sm:$0xff]   ;;  %v1093_v50 = vld [vmem:[%s1455_s5 + $0x58] sm:$0xff]   ;;  %s893_s18 = sld [smem:[#allocation3 + $0x1]] }
  0x27   :  { %599 = vmatprep.subr.bf16.mxu1 %v1067_v53  ;;  %v77_v4 = vrot.slane %v68_v3, %v76_v1  ;;  %v73_v6 = vrot.slane %v68_v3, %v72_v2  ;;  %v1089_v46 = vld [vmem:[%s1455_s5] sm:$0xff]   ;;  %s894_s19 = sld [smem:[#allocation3 + $0x2]] }
  0x28   :  { %986 = vmatpush3.bf16.msra.mxu0 %v1013_v14  ;;  %v1092_v49 = vld [vmem:[%s1455_s5 + $0x60] sm:$0xff]  }
  0x29   :  { %548 = vmatprep.subr.bf16.mxu0 %v1016_v15  ;;  %v80_v15 = vsub.s32 2, %v1357_v0  ;;  %v1096_v53 = vld [vmem:[%s1455_s5 + $0x40] sm:$0xff]  }
  0x2a   :  { %600 = vmatpush1.bf16.msra.mxu1 %v1069_v54 }
  0x2b   :  { %988 = vmatmul.mubr.msk.bf16.vlgmr.msra.gmra.mxu0 %vm135_vm1, %v1010_v10  ;;  %601 = vmatprep.subr.bf16.mxu1 %v1073_v57  ;;  %v239_v13 = vstv %s51_s12 }
  0x2c   :  { %549 = vmatpush1.bf16.msra.mxu0 %v1014_v16 }
  0x2d   :  { %550 = vmatprep.subr.bf16.mxu0 %v1019_v18 }
  0x2e   :  { %602 = vmatpush1.bf16.msra.mxu1 %v1075_v58 }
  0x2f   :  { %603 = vmatprep.subr.bf16.mxu1 %v1076_v59 }
  0x30   :  { %551 = vmatpush1.bf16.msra.mxu0 %v1017_v21 }
  0x31   :  { %552 = vmatprep.subr.bf16.mxu0 %v1022_v22  ;;  %v81_v22 = vrot.slane %v68_v3, %v80_v15 }
  0x32   :  { %604 = vmatpush1.bf16.msra.mxu1 %v1078_v60 }
  0x33   :  { %605 = vmatprep.subr.bf16.mxu1 %v1079_v61 }
  0x34   :  { %553 = vmatpush1.bf16.msra.mxu0 %v1020_v24 }
  0x35   :  { %554 = vmatprep.subr.bf16.mxu0 %v1025_v25 }
  0x36   :  { %606 = vmatpush1.bf16.msra.mxu1 %v1081_v62 }
  0x37   :  { %780 = vmatprep.subr.bf16.mxu1 %v1112_v5 }
  0x38   :  { %555 = vmatpush1.bf16.msra.mxu0 %v1023_v26 }
  0x39   :  { %556 = vmatprep.subr.bf16.mxu0 %v1028_v27 }
  0x3c   :  { %557 = vmatpush1.bf16.msra.mxu0 %v1026_v28 }
  0x3d   :  { %558 = vmatprep.subr.bf16.mxu0 %v1031_v29 }
  0x40   :  { %559 = vmatpush1.bf16.msra.mxu0 %v1029_v30 }
  0x41   :  { %560 = vmatprep.subr.bf16.mxu0 %v1034_v31 }
  0x44   :  { %561 = vmatpush1.bf16.msra.mxu0 %v1032_v32 }
  0x45   :  { %562 = vmatprep.subr.bf16.mxu0 %v1037_v33 }
  0x48   :  { %563 = vmatpush1.bf16.msra.mxu0 %v1035_v34 }
  0x49   :  { %564 = vmatprep.subr.bf16.mxu0 %v1040_v35 }
  0x4c   :  { %565 = vmatpush2.bf16.msra.mxu0 %v1038_v36 }
  0x4d   :  { %566 = vmatprep.subr.bf16.mxu0 %v1043_v37 }
  0x50   :  { %567 = vmatpush2.bf16.msra.mxu0 %v1041_v38 }
  0x51   :  { %568 = vmatprep.subr.bf16.mxu0 %v1046_v39  ;;  %v1082_v39 = vld [vmem:[%s1455_s5 + $0x38] sm:$0xff]  }
  0x54   :  { %569 = vmatpush2.bf16.msra.mxu0 %v1044_v40 }
  0x55   :  { %570 = vmatprep.subr.bf16.mxu0 %v1049_v41  ;;  %v1084_v41 = vld [vmem:[%s1455_s5 + $0x28] sm:$0xff]  }
  0x58   :  { %571 = vmatpush2.bf16.msra.mxu0 %v1047_v42  ;;  %v1085_v42 = vld [vmem:[%s1455_s5 + $0x20] sm:$0xff]  }
  0x59   :  { %572 = vmatprep.subr.bf16.mxu0 %v1054_v43  ;;  %v1086_v43 = vld [vmem:[%s1455_s5 + $0x18] sm:$0xff]  }
  0x5c   :  { %573 = vmatpush2.bf16.msra.mxu0 %v1052_v44  ;;  %v1087_v44 = vld [vmem:[%s1455_s5 + $0x10] sm:$0xff]  }
  0x5d   :  { %574 = vmatprep.subr.bf16.mxu0 %v1060_v47  ;;  %v1090_v47 = vld [vmem:[%s1455_s5 + $0x70] sm:$0xff]  }
  0x60   :  { %575 = vmatpush2.bf16.msra.mxu0 %v1058_v48  ;;  %v1091_v48 = vld [vmem:[%s1455_s5 + $0x68] sm:$0xff]  }
  0x61   :  { %576 = vmatprep.subr.bf16.mxu0 %v1066_v51  ;;  %v1094_v51 = vld [vmem:[%s1455_s5 + $0x50] sm:$0xff]  }
  0x64   :  { %577 = vmatpush2.bf16.msra.mxu0 %v1064_v52  ;;  %v1095_v52 = vld [vmem:[%s1455_s5 + $0x48] sm:$0xff]  }
  0x65   :  { %578 = vmatprep.subr.bf16.mxu0 %v1072_v55 }
  0x68   :  { %579 = vmatpush2.bf16.msra.mxu0 %v1070_v56  ;;  %v300_v56 = vld [vmem:[%s1454_s4] sm:$0x3] }
  0x69   :  { %991 = vmatprep.subr.bf16.mxu0 %v1113_v11  ;;  %v309_v57 = vrot.slane %v300_v56, %v76_v1  ;;  %v305_v58 = vrot.slane %v300_v56, %v72_v2 }
  0xdf   :  { %v183_v7 = vpop.f32.mrf.mxu0 }
  0xe0   :  { %v184_v10 = vadd.f32 %v183_v7, %v73_v6 }
  0xe1   :  { %v185_v8 = vpop.f32.mrf.mxu0 }
  0xe2   :  { %v186_v9 = vadd.f32 %v185_v8, %v77_v4  ;;  %v240_v20 = vmul.f32 %v239_v13, %v184_v10  ;;  %vm233_vm6 = vcmp.gt.f32.partialorder %v184_v10, 0.0 }
  0xe3   :  { %v187_v12 = vpop.f32.mrf.mxu0 }
  0xe4   :  { %v188_v14 = vadd.f32 %v187_v12, %v73_v6  ;;  %v241_v17 = vmul.f32 %v239_v13, %v186_v9  ;;  %vm234_vm5 = vcmp.gt.f32.partialorder %v186_v9, 0.0  ;;  %v246_v26 = vsel %vm233_vm6, %v184_v10, %v240_v20 }
  0xe5   :  { %v189_v16 = vpop.f32.mrf.mxu0 }
  0xe6   :  { %vm236_vm4 = vcmp.gt.f32.partialorder %v188_v14, 0.0  ;;  %v243_v18 = vmul.f32 %v239_v13, %v188_v14  ;;  %v190_v19 = vadd.f32 %v189_v16, %v77_v4  ;;  %v247_v24 = vsel %vm234_vm5, %v186_v9, %v241_v17 }
  0xe7   :  { %v638_v9 = vstv %s893_s18 }
  0xe8   :  { %vm237_vm7 = vcmp.gt.f32.partialorder %v190_v19, 0.0  ;;  %v244_v21 = vmul.f32 %v239_v13, %v190_v19  ;;  %v249_v23 = vsel %vm236_vm4, %v188_v14, %v243_v18 }
  0xe9   :  { %v252_v29 = vpack.c.bf16 %v249_v23, %v246_v26  ;;  %v956_v23 = vld [vmem:[%s1456_s6] ss:$0 sm:$0xff]  ;;  %v823_v26 = vstv %s894_s19 }
  0xea   :  { %v250_v25 = vsel %vm237_vm7, %v190_v19, %v244_v21  ;;  %v829_v21 = vld [vmem:[%s1457_s7] sm:$0xf] }
  0xeb   :  { %v226_v27 = vpop.f32.mrf.mxu0  ;;  %v253_v28 = vpack.c.bf16 %v250_v25, %v247_v24 }
  0xec   :  { %v227_v30 = vadd.f32 %v226_v27, %v81_v22 }
  0xed   :  { %v989_v31 = vpop.f32.mrf.mxu0  ;;  %580 = vmatprep.mubr.bf16.mxu0 %v253_v28 }
  0xee   :  { %581 = vmatmul.mubr.bf16.vlgmr.msra.gmra.mxu0 %v252_v29  ;;  %v242_v33 = vmul.f32 %v239_v13, %v227_v30  ;;  %vm235_vm8 = vcmp.gt.f32.partialorder %v227_v30, 0.0 }
  0xef   :  { %v229_v32 = vpop.f32.mrf.mxu0  ;;  %993 = vmatprep.mubr.msk.bf16.mxu0 %vm1114_vm2, %v1113_v11  ;;  %v1083_v11 = vld [vmem:[%s1455_s5 + $0x30] sm:$0xff]   ;;  %vm837_vm2 = vcmask 64512  }
  0xf0   :  { %v230_v34 = vadd.f32 %v229_v32, %v81_v22  ;;  %v248_v37 = vsel %vm235_vm8, %v227_v30, %v242_v33  ;;  %v842_v22 = vsel %vm541_vm3, %v829_v21, 0  ;;  %vm885_vm3 = vcmask 7168  }
  0xf1   :  { %v990_v35 = vpop.f32.mrf.mxu0  ;;  %992 = vmatpush3.bf16.msra.mxu0 %v842_v22 }
  0xf2   :  { %vm238_vm9 = vcmp.gt.f32.partialorder %v230_v34, 0.0  ;;  %v245_v36 = vmul.f32 %v239_v13, %v230_v34 }
  0xf4   :  { %v251_v38 = vsel %vm238_vm9, %v230_v34, %v245_v36  ;;  %v973_v36 = vld [vmem:[#allocation2] ss:$0 sm:$0xff] }
  0xf5   :  { %v254_v40 = vpack.c.bf16 %v251_v38, %v248_v37 }
  0xf7   :  { %955 = vmatmul.mubr.msk.bf16.vlgmr.msra.gmra.mxu1 %vm537_vm10, %v254_v40 }
  0xf8   :  { %781 = vmatpush1.bf16.msra.mxu1 %v1082_v39 }
  0xf9   :  { %782 = vmatprep.subr.bf16.mxu1 %v1112_v5 }
  0xfc   :  { %783 = vmatpush1.bf16.msra.mxu1 %v1083_v11 }
  0xfd   :  { %784 = vmatprep.subr.bf16.mxu1 %v1112_v5 }
 0x100   :  { %785 = vmatpush1.bf16.msra.mxu1 %v1084_v41 }
 0x101   :  { %786 = vmatprep.subr.bf16.mxu1 %v1112_v5 }
 0x104   :  { %787 = vmatpush1.bf16.msra.mxu1 %v1085_v42 }
 0x105   :  { %788 = vmatprep.subr.bf16.mxu1 %v1112_v5 }
 0x108   :  { %789 = vmatpush1.bf16.msra.mxu1 %v1086_v43 }
 0x109   :  { %790 = vmatprep.subr.bf16.mxu1 %v1112_v5 }
 0x10c   :  { %791 = vmatpush1.bf16.msra.mxu1 %v1087_v44 }
 0x10d   :  { %792 = vmatprep.subr.bf16.mxu1 %v1112_v5 }
 0x110   :  { %793 = vmatpush1.bf16.msra.mxu1 %v1088_v45 }
 0x111   :  { %794 = vmatprep.subr.bf16.mxu1 %v1112_v5 }
 0x114   :  { %795 = vmatpush1.bf16.msra.mxu1 %v1089_v46 }
 0x115   :  { %798 = vmatprep.subr.bf16.mxu1 %v1112_v5 }
 0x118   :  { %799 = vmatpush2.bf16.msra.mxu1 %v1090_v47 }
 0x119   :  { %800 = vmatprep.subr.bf16.mxu1 %v1112_v5 }
 0x11c   :  { %801 = vmatpush2.bf16.msra.mxu1 %v1091_v48 }
 0x11d   :  { %802 = vmatprep.subr.bf16.mxu1 %v1112_v5 }
 0x120   :  { %803 = vmatpush2.bf16.msra.mxu1 %v1092_v49 }
 0x121   :  { %804 = vmatprep.subr.bf16.mxu1 %v1112_v5 }
 0x124   :  { %805 = vmatpush2.bf16.msra.mxu1 %v1093_v50 }
 0x125   :  { %806 = vmatprep.subr.bf16.mxu1 %v1112_v5 }
 0x128   :  { %807 = vmatpush2.bf16.msra.mxu1 %v1094_v51 }
 0x129   :  { %808 = vmatprep.subr.bf16.mxu1 %v1112_v5 }
 0x12c   :  { %809 = vmatpush2.bf16.msra.mxu1 %v1095_v52 }
 0x12d   :  { %810 = vmatprep.subr.bf16.mxu1 %v1112_v5 }
 0x130   :  { %811 = vmatpush2.bf16.msra.mxu1 %v1096_v53 }
 0x1ae   :  { %v582_v54 = vpop.f32.mrf.mxu0 }
 0x1af   :  { %v583_v61 = vadd.f32 %v582_v54, %v305_v58 }
 0x1b0   :  { %v584_v55 = vpop.f32.mrf.mxu0 }
 0x1b1   :  { %v585_v60 = vadd.f32 %v584_v55, %v309_v57 }
 0x1b2   :  { %v586_v59 = vpop.f32.mrf.mxu0 }
 0x1b3   :  { %v587_v3 = vadd.f32 %v586_v59, %v305_v58 }
 0x1b4   :  { %v588_v62 = vpop.f32.mrf.mxu0 }
 0x1b5   :  { %v589_v8 = vadd.f32 %v588_v62, %v309_v57 }
 0x1b7   :  { %v625_v5 = vpop.f32.mrf.mxu1 }
 0x1b8   :  { %v626_v6 = vadd.f32 %v625_v5, %v583_v61 }
 0x1b9   :  { %v627_v63 = vpop.f32.mrf.mxu1 }
 0x1ba   :  { %v628_v4 = vadd.f32 %v627_v63, %v585_v60  ;;  %v639_v0 = vmul.f32 %v638_v9, %v626_v6  ;;  %vm634_vm13 = vcmp.gt.f32.partialorder %v626_v6, 0.0 }
 0x1bb   :  { %v629_v7 = vpop.f32.mrf.mxu1 }
 0x1bc   :  { %v630_v10 = vadd.f32 %v629_v7, %v587_v3  ;;  %v640_v13 = vmul.f32 %v638_v9, %v628_v4  ;;  %vm635_vm12 = vcmp.gt.f32.partialorder %v628_v4, 0.0  ;;  %v643_v18 = vsel %vm634_vm13, %v626_v6, %v639_v0 }
 0x1bd   :  { %v631_v12 = vpop.f32.mrf.mxu1 }
 0x1be   :  { %vm636_vm11 = vcmp.gt.f32.partialorder %v630_v10, 0.0  ;;  %v641_v1 = vmul.f32 %v638_v9, %v630_v10  ;;  %v632_v14 = vadd.f32 %v631_v12, %v589_v8  ;;  %v644_v16 = vsel %vm635_vm12, %v628_v4, %v640_v13 }
 0x1c0   :  { %vm637_vm14 = vcmp.gt.f32.partialorder %v632_v14, 0.0  ;;  %v642_v2 = vmul.f32 %v638_v9, %v632_v14  ;;  %v645_v15 = vsel %vm636_vm11, %v630_v10, %v641_v1 }
 0x1c1   :  { %v647_v20 = vpack.c.bf16 %v645_v15, %v643_v18 }
 0x1c2   :  { %v646_v17 = vsel %vm637_vm14, %v632_v14, %v642_v2 }
 0x1c3   :  { %v648_v19 = vpack.c.bf16 %v646_v17, %v644_v16 }
 0x1c5   :  { %972 = vmatprep.mubr.msk.bf16.mxu1 %vm776_vm15, %v648_v19 }
 0x1c6   :  { %813 = vmatmul.mubr.bf16.vlgmr.msra.gmra.mxu1 %v647_v20 }
 0x286   :  { %v814_v24 = vpop.f32.mrf.mxu1 }
 0x287   :  { %v815_v25 = vadd.f32 %v956_v23, %v814_v24 }
 0x288   :  { %v816_v27 = vpop.f32.mrf.mxu1 }
 0x289   :  { %v824_v29 = vmul.f32 %v823_v26, %v815_v25  ;;  %vm821_vm0 = vcmp.gt.f32.partialorder %v815_v25, 0.0 }
 0x28a   :  { %v817_v28 = vpop.f32.mrf.mxu1 }
 0x28b   :  { %v818_v30 = vadd.f32 %v956_v23, %v817_v28  ;;  %v826_v33 = vsel %vm821_vm0, %v815_v25, %v824_v29 }
 0x28c   :  { %v819_v31 = vpop.f32.mrf.mxu1 }
 0x28d   :  { %vm822_vm1 = vcmp.gt.f32.partialorder %v818_v30, 0.0  ;;  %v825_v32 = vmul.f32 %v823_v26, %v818_v30 }
 0x28f   :  { %v827_v34 = vsel %vm822_vm1, %v818_v30, %v825_v32 }
 0x290   :  { %v828_v35 = vpack.c.bf16 %v827_v34, %v826_v33 }
 0x292   :  { %994 = vmatmul.mubr.msk.bf16.vlgmr.msra.gmra.mxu0 %vm837_vm2, %v828_v35 }
 0x352   :  { %v878_v37 = vpop.f32.mrf.mxu0 }
 0x353   :  { %v879_v38 = vadd.f32 %v973_v36, %v878_v37 }
 0x354   :  { %v995_v39 = vpop.f32.mrf.mxu0 }
 0x355   :  { %886 = vst.msk [vmem:[%s1460_s10] sm:$0xff] %vm885_vm3, %v879_v38 }
 0x356   :  { %v881_v40 = vpop.f32.mrf.mxu0 }
 0x357   :  { %v882_v11 = vadd.f32 %v973_v36, %v881_v40 }
 0x358   :  { %v996_v41 = vpop.f32.mrf.mxu0 }
 0x359   :  { %887 = vst.msk [vmem:[%s1460_s10 + $0x8] sm:$0xff] %vm885_vm3, %v882_v11 }
 0x35a   :  { %892 = vsyncpa [#allocation4], 1 }

</bundles_post_ra>
